<compile_context>
chip_gen: v5e
topology: v5e:2x2
jax: 0.10.0
libtpu: 0.0.40
codegen_flags: <defaults>
</compile_context>

<pallas_src>
import functools

import jax
import jax.numpy as jnp
from jax.experimental import pallas as pl
from jax.experimental.pallas import tpu as pltpu


def gen_kernel(x_ref, w1_ref, b1_ref, w2_ref, b2_ref, w3_ref, b3_ref, o_ref,
               *, compute_dtype):
    # Hoist bias loads once.
    b1 = b1_ref[...]
    b2 = b2_ref[...]
    b3 = b3_ref[...]

    # Cast the x tile to the MXU compute dtype in-kernel (no extra HBM pass).
    x = x_ref[...].astype(compute_dtype)

    # fc1 + relu   (bf16 operands, f32 accumulation on the MXU)
    h1 = jnp.dot(x, w1_ref[...], preferred_element_type=jnp.float32)
    h1 = jnp.maximum(h1 + b1, 0.0)

    # fc2 + relu
    h2 = jnp.dot(h1.astype(compute_dtype), w2_ref[...],
                 preferred_element_type=jnp.float32)
    h2 = jnp.maximum(h2 + b2, 0.0)

    # dropout: identity in eval mode
    # TODO(synk): training-mode dropout (prng_random_bits + 1/(1-p) rescale).

    # fc_flat + tanh
    h3 = jnp.dot(h2.astype(compute_dtype), w3_ref[...],
                 preferred_element_type=jnp.float32)
    o_ref[...] = jnp.tanh(h3 + b3).astype(o_ref.dtype)


def gen_forward(x, w1, b1, w2, b2, w3, b3, *, batch_tile=None,
                compute_dtype=jnp.bfloat16):
    N, latent_dim = x.shape
    h1_dim = w1.shape[1]            # 256
    h2_dim = w2.shape[1]            # 512
    feat_shape = w3.shape[1]
    out_dtype = x.dtype

    if compute_dtype is None:
        compute_dtype = x.dtype

    # Cast the (small, grid-resident) weights once in the wrapper.
    w1 = w1.astype(compute_dtype)
    w2 = w2.astype(compute_dtype)
    w3 = w3.astype(compute_dtype)

    # Biases as (1, out) f32 rows so in-kernel broadcasting is a 2D f32 add.
    b1 = b1.reshape(1, h1_dim).astype(jnp.float32)
    b2 = b2.reshape(1, h2_dim).astype(jnp.float32)
    b3 = b3.reshape(1, feat_shape).astype(jnp.float32)

    # ---- batch tiling ---------------------------------------------------------
    # Small N:    one fat grid step, block == full batch dim (always legal, no pad).
    # Mid N:      exactly 2 balanced steps -> both TensorCores busy on v7x.
    # Large N:    1024-row tiles (amortizes per-step overhead on v5e/v6e single TC;
    #             still >= 3 steps so v7x stays balanced). Ragged last block is
    #             handled by Pallas masking; no wrapper-side padding of x.
    if batch_tile is None:
        if N <= 512:
            batch_tile = N
        elif N <= 2048:
            batch_tile = ((pl.cdiv(N, 2) + 15) // 16) * 16
        else:
            batch_tile = 1024
    n_tiles = pl.cdiv(N, batch_tile)

    # Advisory cost hint for XLA scheduling around the custom call.
    flops = 2 * N * (latent_dim * h1_dim + h1_dim * h2_dim + h2_dim * feat_shape)
    bytes_accessed = (
        x.size * x.dtype.itemsize
        + N * feat_shape * jnp.dtype(out_dtype).itemsize
        + sum(int(a.size) * a.dtype.itemsize for a in (w1, w2, w3, b1, b2, b3))
    )
    cost = pl.CostEstimate(flops=flops,
                           transcendentals=N * feat_shape,
                           bytes_accessed=bytes_accessed)

    kernel = functools.partial(gen_kernel, compute_dtype=compute_dtype)

    out = pl.pallas_call(
        kernel,
        out_shape=jax.ShapeDtypeStruct((N, feat_shape), out_dtype),
        grid_spec=pltpu.PrefetchScalarGridSpec(
            num_scalar_prefetch=0,
            grid=(n_tiles,),
            in_specs=[
                # x: tiled along the batch (last dim == full latent_dim)
                pl.BlockSpec((batch_tile, latent_dim), lambda i: (i, 0)),
                # weights / biases: whole array, resident across the grid
                pl.BlockSpec((latent_dim, h1_dim), lambda i: (0, 0)),
                pl.BlockSpec((1, h1_dim), lambda i: (0, 0)),
                pl.BlockSpec((h1_dim, h2_dim), lambda i: (0, 0)),
                pl.BlockSpec((1, h2_dim), lambda i: (0, 0)),
                pl.BlockSpec((h2_dim, feat_shape), lambda i: (0, 0)),
                pl.BlockSpec((1, feat_shape), lambda i: (0, 0)),
            ],
            out_specs=pl.BlockSpec((batch_tile, feat_shape), lambda i: (i, 0)),
        ),
        compiler_params=pltpu.CompilerParams(
            dimension_semantics=("parallel",),
        ),
        cost_estimate=cost,
    )(x, w1, b1, w2, b2, w3, b3)

    return out


if __name__ == "__main__":
    # Module hyper-params (forward only depends on latent_dim and feat_shape)
    latent_dim = 32
    feat_shape = 64
    num_pred = 5          # unused in forward
    dropout = 0.5         # eval mode -> identity
    N = 8                 # small batch

    key = jax.random.PRNGKey(0)
    kx, k1, k2, k3, kb1, kb2, kb3 = jax.random.split(key, 7)

    x = jax.random.normal(kx, (N, latent_dim), dtype=jnp.float32)

    # deterministic synthetic parameters (stored as (in, out))
    w1 = jax.random.normal(k1, (latent_dim, 256), dtype=jnp.float32) * 0.05
    b1 = jax.random.normal(kb1, (256,), dtype=jnp.float32) * 0.05
    w2 = jax.random.normal(k2, (256, 512), dtype=jnp.float32) * 0.05
    b2 = jax.random.normal(kb2, (512,), dtype=jnp.float32) * 0.05
    w3 = jax.random.normal(k3, (512, feat_shape), dtype=jnp.float32) * 0.05
    b3 = jax.random.normal(kb3, (feat_shape,), dtype=jnp.float32) * 0.05

    # plain-JAX f32 reference
    ref = jnp.tanh(
        jnp.maximum(jnp.maximum(x @ w1 + b1, 0.0) @ w2 + b2, 0.0) @ w3 + b3
    )

    # 1) default bf16 MXU path (f32 accumulation) -> loose tolerance vs f32 ref
    out_bf16 = gen_forward(x, w1, b1, w2, b2, w3, b3)
    jax.block_until_ready(out_bf16)
    assert out_bf16.shape == (N, feat_shape)
    assert out_bf16.dtype == jnp.float32
    assert jnp.allclose(out_bf16, ref, atol=2e-2, rtol=2e-2)

    # 2) pure f32 path -> tight tolerance
    out_f32 = gen_forward(x, w1, b1, w2, b2, w3, b3, compute_dtype=jnp.float32)
    jax.block_until_ready(out_f32)
    assert jnp.allclose(out_f32, ref, atol=1e-5, rtol=1e-5)

    # 3) multi-step grid with a ragged last block (exercises tiling/masking path)
    N2 = 600
    x2 = jax.random.normal(jax.random.PRNGKey(1), (N2, latent_dim), dtype=jnp.float32)
    ref2 = jnp.tanh(
        jnp.maximum(jnp.maximum(x2 @ w1 + b1, 0.0) @ w2 + b2, 0.0) @ w3 + b3
    )
    out2 = gen_forward(x2, w1, b1, w2, b2, w3, b3)
    jax.block_until_ready(out2)
    assert out2.shape == (N2, feat_shape)
    assert jnp.allclose(out2, ref2, atol=3e-2, rtol=3e-2)

    print("KERNEL_OK")
</pallas_src>

<mosaic_0001>
module attributes {stable_mosaic.version = 11 : i64} {
  func.func @gen_kernel(%arg0: i32, %arg1: memref<8x32xf32, #tpu.memory_space<vmem>>, %arg2: memref<32x256xbf16, #tpu.memory_space<vmem>>, %arg3: memref<1x256xf32, #tpu.memory_space<vmem>>, %arg4: memref<256x512xbf16, #tpu.memory_space<vmem>>, %arg5: memref<1x512xf32, #tpu.memory_space<vmem>>, %arg6: memref<512x64xbf16, #tpu.memory_space<vmem>>, %arg7: memref<1x64xf32, #tpu.memory_space<vmem>>, %arg8: memref<8x64xf32, #tpu.memory_space<vmem>>) attributes {dimension_semantics = [#tpu.dimension_semantics<parallel>], iteration_bounds = array<i64: 1>, scalar_prefetch = 0 : i64, scratch_operands = 0 : i64, tpu.core_type = #tpu.core_type<tc>, window_params = [{transform_indices = @transform_0, window_bounds = array<i64: 8, 32>}, {pipeline_mode = #tpu.pipeline_mode<synchronous>, transform_indices = @transform_1, window_bounds = array<i64: 32, 256>}, {pipeline_mode = #tpu.pipeline_mode<synchronous>, transform_indices = @transform_2, window_bounds = array<i64: 1, 256>}, {pipeline_mode = #tpu.pipeline_mode<synchronous>, transform_indices = @transform_3, window_bounds = array<i64: 256, 512>}, {pipeline_mode = #tpu.pipeline_mode<synchronous>, transform_indices = @transform_4, window_bounds = array<i64: 1, 512>}, {pipeline_mode = #tpu.pipeline_mode<synchronous>, transform_indices = @transform_5, window_bounds = array<i64: 512, 64>}, {pipeline_mode = #tpu.pipeline_mode<synchronous>, transform_indices = @transform_6, window_bounds = array<i64: 1, 64>}, {transform_indices = @transform_7, window_bounds = array<i64: 8, 64>}]} {
    %c0 = arith.constant 0 : index
    %c0_0 = arith.constant 0 : index
    %0 = vector.load %arg3[%c0, %c0_0] : memref<1x256xf32, #tpu.memory_space<vmem>>, vector<1x256xf32>
    %c0_1 = arith.constant 0 : index
    %c0_2 = arith.constant 0 : index
    %1 = vector.load %arg5[%c0_1, %c0_2] : memref<1x512xf32, #tpu.memory_space<vmem>>, vector<1x512xf32>
    %c0_3 = arith.constant 0 : index
    %c0_4 = arith.constant 0 : index
    %2 = vector.load %arg7[%c0_3, %c0_4] : memref<1x64xf32, #tpu.memory_space<vmem>>, vector<1x64xf32>
    %c0_5 = arith.constant 0 : index
    %c0_6 = arith.constant 0 : index
    %3 = vector.load %arg1[%c0_5, %c0_6] : memref<8x32xf32, #tpu.memory_space<vmem>>, vector<8x32xf32>
    %4 = arith.truncf %3 : vector<8x32xf32> to vector<8x32xbf16>
    %c0_7 = arith.constant 0 : index
    %c0_8 = arith.constant 0 : index
    %5 = vector.load %arg2[%c0_7, %c0_8] : memref<32x256xbf16, #tpu.memory_space<vmem>>, vector<32x256xbf16>
    %cst = arith.constant dense<0.000000e+00> : vector<8x256xf32>
    %6 = tpu.matmul %4, %5, %cst {dimension_numbers = #tpu.dot_dimension_numbers<[1], [0], [0], [1], [0, 0, 1, 1], [], []>} : vector<8x32xbf16>, vector<32x256xbf16>, vector<8x256xf32> -> vector<8x256xf32>
    %7 = vector.broadcast %0 : vector<1x256xf32> to vector<8x256xf32>
    %8 = arith.addf %6, %7 : vector<8x256xf32>
    %cst_9 = arith.constant 0.000000e+00 : f32
    %9 = vector.broadcast %cst_9 : f32 to vector<8x256xf32>
    %10 = arith.maximumf %8, %9 : vector<8x256xf32>
    %11 = arith.truncf %10 : vector<8x256xf32> to vector<8x256xbf16>
    %c0_10 = arith.constant 0 : index
    %c0_11 = arith.constant 0 : index
    %12 = vector.load %arg4[%c0_10, %c0_11] : memref<256x512xbf16, #tpu.memory_space<vmem>>, vector<256x512xbf16>
    %cst_12 = arith.constant dense<0.000000e+00> : vector<8x512xf32>
    %13 = tpu.matmul %11, %12, %cst_12 {dimension_numbers = #tpu.dot_dimension_numbers<[1], [0], [0], [1], [0, 0, 1, 1], [], []>} : vector<8x256xbf16>, vector<256x512xbf16>, vector<8x512xf32> -> vector<8x512xf32>
    %14 = vector.broadcast %1 : vector<1x512xf32> to vector<8x512xf32>
    %15 = arith.addf %13, %14 : vector<8x512xf32>
    %cst_13 = arith.constant 0.000000e+00 : f32
    %16 = vector.broadcast %cst_13 : f32 to vector<8x512xf32>
    %17 = arith.maximumf %15, %16 : vector<8x512xf32>
    %18 = arith.truncf %17 : vector<8x512xf32> to vector<8x512xbf16>
    %c0_14 = arith.constant 0 : index
    %c0_15 = arith.constant 0 : index
    %19 = vector.load %arg6[%c0_14, %c0_15] : memref<512x64xbf16, #tpu.memory_space<vmem>>, vector<512x64xbf16>
    %cst_16 = arith.constant dense<0.000000e+00> : vector<8x64xf32>
    %20 = tpu.matmul %18, %19, %cst_16 {dimension_numbers = #tpu.dot_dimension_numbers<[1], [0], [0], [1], [0, 0, 1, 1], [], []>} : vector<8x512xbf16>, vector<512x64xbf16>, vector<8x64xf32> -> vector<8x64xf32>
    %21 = vector.broadcast %2 : vector<1x64xf32> to vector<8x64xf32>
    %22 = arith.addf %20, %21 : vector<8x64xf32>
    %23 = math.tanh %22 : vector<8x64xf32>
    %c0_17 = arith.constant 0 : index
    %c0_18 = arith.constant 0 : index
    %24 = vector.load %arg8[%c0_17, %c0_18] : memref<8x64xf32, #tpu.memory_space<vmem>>, vector<8x64xf32>
    tpu.vector_store %arg8[%c0_17, %c0_18], %23 {strides = array<i32>} : memref<8x64xf32, #tpu.memory_space<vmem>>, vector<8x64xf32>,
    return
  }
  func.func @transform_0(%arg0: i32) -> (i32, i32) {
    %c0_i32 = arith.constant 0 : i32
    %c0_i32_0 = arith.constant 0 : i32
    return %arg0, %c0_i32 : i32, i32
  }
  func.func @transform_1(%arg0: i32) -> (i32, i32) {
    %c0_i32 = arith.constant 0 : i32
    %c0_i32_0 = arith.constant 0 : i32
    %c0_i32_1 = arith.constant 0 : i32
    return %c0_i32, %c0_i32_0 : i32, i32
  }
  func.func @transform_2(%arg0: i32) -> (i32, i32) {
    %c0_i32 = arith.constant 0 : i32
    %c0_i32_0 = arith.constant 0 : i32
    %c0_i32_1 = arith.constant 0 : i32
    return %c0_i32, %c0_i32_0 : i32, i32
  }
  func.func @transform_3(%arg0: i32) -> (i32, i32) {
    %c0_i32 = arith.constant 0 : i32
    %c0_i32_0 = arith.constant 0 : i32
    %c0_i32_1 = arith.constant 0 : i32
    return %c0_i32, %c0_i32_0 : i32, i32
  }
  func.func @transform_4(%arg0: i32) -> (i32, i32) {
    %c0_i32 = arith.constant 0 : i32
    %c0_i32_0 = arith.constant 0 : i32
    %c0_i32_1 = arith.constant 0 : i32
    return %c0_i32, %c0_i32_0 : i32, i32
  }
  func.func @transform_5(%arg0: i32) -> (i32, i32) {
    %c0_i32 = arith.constant 0 : i32
    %c0_i32_0 = arith.constant 0 : i32
    %c0_i32_1 = arith.constant 0 : i32
    return %c0_i32, %c0_i32_0 : i32, i32
  }
  func.func @transform_6(%arg0: i32) -> (i32, i32) {
    %c0_i32 = arith.constant 0 : i32
    %c0_i32_0 = arith.constant 0 : i32
    %c0_i32_1 = arith.constant 0 : i32
    return %c0_i32, %c0_i32_0 : i32, i32
  }
  func.func @transform_7(%arg0: i32) -> (i32, i32) {
    %c0_i32 = arith.constant 0 : i32
    %c0_i32_0 = arith.constant 0 : i32
    return %arg0, %c0_i32 : i32, i32
  }
}

</mosaic_0001>

<bundles_post_ra>
// kernel: tpu_custom_call.1
= control target key start
LH: loop header
LB: loop body
LE: loop exit
PB: predicated region body
PF: predicated region fallthrough
CT: control target
= control target key end

     0   :  { %12 = vsyncpa [#allocation3], 0  ;;  %s1693_s0 = inlined_call_operand.vmem [shape: f32[8,32], index: 0, kind: input, shape index: {}]   ;;  %s1694_s1 = inlined_call_operand.vmem [shape: bf16[32,256], index: 1, kind: input, shape index: {}]   ;;  %s1695_s2 = inlined_call_operand.vmem [shape: f32[1,256], index: 2, kind: input, shape index: {}]   ;;  %s1696_s3 = inlined_call_operand.hbm [shape: bf16[256,512], index: 3, kind: input, shape index: {}]   ;;  %s1697_s4 = inlined_call_operand.vmem [shape: f32[1,512], index: 4, kind: input, shape index: {}]   ;;  %s1698_s5 = inlined_call_operand.vmem [shape: bf16[512,64], index: 5, kind: input, shape index: {}]   ;;  %s1699_s6 = inlined_call_operand.vmem [shape: f32[1,64], index: 6, kind: input, shape index: {}]   ;;  %s1700_s7 = inlined_call_operand.hbm [shape: f32[8,64], index: 7, kind: output, shape index: {}]  }
   0x1   :  { %13 = vsyncpa [#allocation4], 0  ;;  %s24_s26 = sshll.u32 %s1696_s3, 4  ;;  %s1509_s27 = smov [#allocation2]   ;;  %s25_s26 = int_to_ptr.hbm [resolvable:$true] %s24_s26 }
   0x2   :  { %s26_s28 = sshll.u32 %s1509_s27, 4  ;;  %s1510_s29 = smov 256   ;;  %s27_s28 = int_to_ptr.vmem [resolvable:$true] %s26_s28 }
   0x3   :  { %s1511_s30 = smov 16  }
   0x4   :  { %32 = dma.hbm_to_vmem [thread:$0]  %s25_s26, 8192, %s27_s28, [#allocation3], %s1510_s29, %s1510_s29, %s1511_s30  }
   0x5   :  { %1505 = dma.done.wait [#allocation3], 8192  }
   0x6   :  { %1506 = vsyncadd [#allocation3], 4294959104  ;;  %v958_v0 = vld [vmem:[%s1694_s1 + $0x10] sm:$0xf]  ;;  %v1353_v1 = vld [vmem:[%s1694_s1 + $0x14] sm:$0xf0] }
   0x7   :  { %v1352_v2 = vld [vmem:[%s1694_s1 + $0x14] sm:$0xf]  ;;  %v959_v3 = vor.u32 %v1353_v1, %v958_v0  ;;  %v960_v4 = vld [vmem:[%s1694_s1 + $0x18] sm:$0xf0]  ;;  %v950_v5 = vld [vmem:[%s1694_s1] sm:$0xf] }
   0x8   :  { %v1351_v6 = vld [vmem:[%s1694_s1 + $0x4] sm:$0xf0]  ;;  %v963_v7 = vor.u32 %v1352_v2, %v960_v4  ;;  %v1350_v8 = vld [vmem:[%s1694_s1 + $0x4] sm:$0xf]  ;;  %v952_v9 = vld [vmem:[%s1694_s1 + $0x8] sm:$0xf0] }
   0x9   :  { %v47_v10 = vld [vmem:[%s1693_s0] sm:$0xff]  ;;  %vm78_vm0 = vcmask 261120   ;;  %88 = vmatpush.bf16.msra.mxu0 %v959_v3  ;;  %v951_v11 = vor.u32 %v1351_v6, %v950_v5  ;;  %v1384_v13 = vld [vmem:[#allocation2 + $0xec] sm:$0xf0]  ;;  %v955_v15 = vor.u32 %v1350_v8, %v952_v9  ;;  %v1082_v19 = vld [vmem:[#allocation2 + $0xf0] sm:$0xf0] }
   0xa   :  { %v1080_v12 = vld [vmem:[#allocation2 + $0xe0] sm:$0xf]  ;;  %101 = vmatpush.bf16.msra.mxu1 %v963_v7  ;;  %v1416_v17 = vld [vmem:[#allocation2 + $0x1ec] sm:$0xf0]  ;;  %v1382_v18 = vld [vmem:[#allocation2 + $0xe4] sm:$0xf]  ;;  %v48_v25 = vpack.c.bf16 %v47_v10, %v47_v10 }
   0xb   :  { %v1208_v14 = vld [vmem:[#allocation2 + $0x1e0] sm:$0xf]  ;;  %v1081_v16 = vor.u32 %v1384_v13, %v1080_v12  ;;  %v1085_v21 = vor.u32 %v1382_v18, %v1082_v19  ;;  %v1414_v22 = vld [vmem:[#allocation2 + $0x1e4] sm:$0xf]  ;;  %v1210_v23 = vld [vmem:[#allocation2 + $0x1f0] sm:$0xf0] }
   0xc   :  { %v1209_v20 = vor.u32 %v1416_v17, %v1208_v14  ;;  %v1064_v24 = vld [vmem:[#allocation2 + $0xc0] sm:$0xf]  ;;  %v1213_v26 = vor.u32 %v1414_v22, %v1210_v23  ;;  %v1380_v27 = vld [vmem:[#allocation2 + $0xcc] sm:$0xf0]  ;;  %v1378_v32 = vld [vmem:[#allocation2 + $0xc4] sm:$0xf] }
   0xd   :  { %505 = vmatpush.bf16.msra.mxu2 %v1081_v16  ;;  %v1192_v28 = vld [vmem:[#allocation2 + $0x1c0] sm:$0xf]  ;;  %v1412_v29 = vld [vmem:[#allocation2 + $0x1cc] sm:$0xf0]  ;;  %89 = vmatpush.bf16.msra.mxu0 %v951_v11  ;;  %v1065_v30 = vor.u32 %v1380_v27, %v1064_v24  ;;  %v1066_v33 = vld [vmem:[#allocation2 + $0xd0] sm:$0xf0] }
   0xe   :  { %518 = vmatpush.bf16.msra.mxu3 %v1209_v20  ;;  %v1193_v31 = vor.u32 %v1412_v29, %v1192_v28  ;;  %v1410_v34 = vld [vmem:[#allocation2 + $0x1c4] sm:$0xf]  ;;  %102 = vmatpush.bf16.msra.mxu1 %v955_v15  ;;  %v1069_v35 = vor.u32 %v1378_v32, %v1066_v33  ;;  %v1194_v36 = vld [vmem:[#allocation2 + $0x1d0] sm:$0xf0]  ;;  %v1048_v37 = vld [vmem:[#allocation2 + $0xa0] sm:$0xf] }
   0xf   :  { %v1376_v38 = vld [vmem:[#allocation2 + $0xac] sm:$0xf0]  ;;  %v1197_v39 = vor.u32 %v1410_v34, %v1194_v36  ;;  %v1176_v40 = vld [vmem:[#allocation2 + $0x1a0] sm:$0xf]  ;;  %v1374_v42 = vld [vmem:[#allocation2 + $0xa4] sm:$0xf] }
  0x10   :  { %v1408_v41 = vld [vmem:[#allocation2 + $0x1ac] sm:$0xf0]  ;;  %964 = vmatmul.msk.bf16.vlgmr.msra.gmra.mxu0 %vm78_vm0, %v48_v25  ;;  %v1049_v43 = vor.u32 %v1376_v38, %v1048_v37  ;;  %v1050_v44 = vld [vmem:[#allocation2 + $0xb0] sm:$0xf0]  ;;  %v1406_v45 = vld [vmem:[#allocation2 + $0x1a4] sm:$0xf] }
  0x11   :  { %531 = vmatpush.bf16.msrb.mxu0 %v1085_v21  ;;  %506 = vmatpush.bf16.msra.mxu2 %v1065_v30  ;;  %v1178_v46 = vld [vmem:[#allocation2 + $0x1b0] sm:$0xf0]  ;;  %v1177_v47 = vor.u32 %v1408_v41, %v1176_v40  ;;  %v1032_v48 = vld [vmem:[#allocation2 + $0x80] sm:$0xf]  ;;  %v1372_v49 = vld [vmem:[#allocation2 + $0x8c] sm:$0xf0]  ;;  %v1053_v50 = vor.u32 %v1374_v42, %v1050_v44 }
  0x12   :  { %544 = vmatpush.bf16.msrb.mxu1 %v1213_v26  ;;  %519 = vmatpush.bf16.msra.mxu3 %v1193_v31  ;;  %v1160_v51 = vld [vmem:[#allocation2 + $0x180] sm:$0xf]  ;;  %v1404_v52 = vld [vmem:[#allocation2 + $0x18c] sm:$0xf0]  ;;  %v1181_v53 = vor.u32 %v1406_v45, %v1178_v46  ;;  %v1370_v54 = vld [vmem:[#allocation2 + $0x84] sm:$0xf]  ;;  %v1033_v56 = vor.u32 %v1372_v49, %v1032_v48 }
  0x13   :  { %965 = vmatmul.msk.bf16.vlgmr.msra.gmra.mxu1 %vm78_vm0, %v48_v25  ;;  %v1034_v55 = vld [vmem:[#allocation2 + $0x90] sm:$0xf0]  ;;  %v1402_v57 = vld [vmem:[#allocation2 + $0x184] sm:$0xf]  ;;  %v1161_v59 = vor.u32 %v1404_v52, %v1160_v51  ;;  %v1016_v60 = vld [vmem:[#allocation2 + $0x60] sm:$0xf] }
  0x14   :  { %v1162_v58 = vld [vmem:[#allocation2 + $0x190] sm:$0xf0]  ;;  %v1368_v61 = vld [vmem:[#allocation2 + $0x6c] sm:$0xf0]  ;;  %v1037_v62 = vor.u32 %v1370_v54, %v1034_v55  ;;  %v1144_v63 = vld [vmem:[#allocation2 + $0x160] sm:$0xf] }
  0x15   :  { %532 = vmatpush.bf16.msrb.mxu0 %v1069_v35  ;;  %507 = vmatpush.bf16.msra.mxu2 %v1049_v43  ;;  %v1400_v0 = vld [vmem:[#allocation2 + $0x16c] sm:$0xf0]  ;;  %v1165_v1 = vor.u32 %v1402_v57, %v1162_v58  ;;  %v1366_v2 = vld [vmem:[#allocation2 + $0x64] sm:$0xf]  ;;  %v1018_v3 = vld [vmem:[#allocation2 + $0x70] sm:$0xf0]  ;;  %v1017_v4 = vor.u32 %v1368_v61, %v1016_v60 }
  0x16   :  { %545 = vmatpush.bf16.msrb.mxu1 %v1197_v39  ;;  %520 = vmatpush.bf16.msra.mxu3 %v1177_v47  ;;  %v1398_v5 = vld [vmem:[#allocation2 + $0x164] sm:$0xf]  ;;  %v1146_v6 = vld [vmem:[#allocation2 + $0x170] sm:$0xf0]  ;;  %v1145_v7 = vor.u32 %v1400_v0, %v1144_v63  ;;  %v1000_v8 = vld [vmem:[#allocation2 + $0x40] sm:$0xf]  ;;  %v1021_v10 = vor.u32 %v1366_v2, %v1018_v3 }
  0x17   :  { %v1364_v9 = vld [vmem:[#allocation2 + $0x4c] sm:$0xf0]  ;;  %v1128_v11 = vld [vmem:[#allocation2 + $0x140] sm:$0xf]  ;;  %v1149_v13 = vor.u32 %v1398_v5, %v1146_v6  ;;  %v1362_v14 = vld [vmem:[#allocation2 + $0x44] sm:$0xf] }
  0x18   :  { %v1396_v12 = vld [vmem:[#allocation2 + $0x14c] sm:$0xf0]  ;;  %v1002_v15 = vld [vmem:[#allocation2 + $0x50] sm:$0xf0]  ;;  %v1001_v16 = vor.u32 %v1364_v9, %v1000_v8  ;;  %v1394_v17 = vld [vmem:[#allocation2 + $0x144] sm:$0xf] }
  0x19   :  { %533 = vmatpush.bf16.msrb.mxu0 %v1053_v50  ;;  %508 = vmatpush.bf16.msra.mxu2 %v1033_v56  ;;  %v1130_v18 = vld [vmem:[#allocation2 + $0x150] sm:$0xf0]  ;;  %v1129_v19 = vor.u32 %v1396_v12, %v1128_v11  ;;  %v984_v20 = vld [vmem:[#allocation2 + $0x20] sm:$0xf]  ;;  %v1360_v21 = vld [vmem:[#allocation2 + $0x2c] sm:$0xf0]  ;;  %v1005_v22 = vor.u32 %v1362_v14, %v1002_v15 }
  0x1a   :  { %546 = vmatpush.bf16.msrb.mxu1 %v1181_v53  ;;  %521 = vmatpush.bf16.msra.mxu3 %v1161_v59  ;;  %v1112_v23 = vld [vmem:[#allocation2 + $0x120] sm:$0xf]  ;;  %v1392_v24 = vld [vmem:[#allocation2 + $0x12c] sm:$0xf0]  ;;  %v1358_v25 = vld [vmem:[#allocation2 + $0x24] sm:$0xf]  ;;  %v1133_v26 = vor.u32 %v1394_v17, %v1130_v18  ;;  %v985_v30 = vor.u32 %v1360_v21, %v984_v20 }
  0x1b   :  { %v986_v27 = vld [vmem:[#allocation2 + $0x30] sm:$0xf0]  ;;  %v1390_v28 = vld [vmem:[#allocation2 + $0x124] sm:$0xf]  ;;  %v968_v31 = vld [vmem:[#allocation2] sm:$0xf]  ;;  %v1113_v34 = vor.u32 %v1392_v24, %v1112_v23 }
  0x1c   :  { %v1114_v29 = vld [vmem:[#allocation2 + $0x130] sm:$0xf0]  ;;  %v1356_v32 = vld [vmem:[#allocation2 + $0xc] sm:$0xf0]  ;;  %v1096_v33 = vld [vmem:[#allocation2 + $0x100] sm:$0xf]  ;;  %v989_v38 = vor.u32 %v1358_v25, %v986_v27 }
  0x1d   :  { %534 = vmatpush.bf16.msrb.mxu0 %v1037_v62  ;;  %509 = vmatpush.bf16.msra.mxu2 %v1017_v4  ;;  %v1388_v35 = vld [vmem:[#allocation2 + $0x10c] sm:$0xf0]  ;;  %v1354_v36 = vld [vmem:[#allocation2 + $0x4] sm:$0xf]  ;;  %v970_v37 = vld [vmem:[#allocation2 + $0x10] sm:$0xf0]  ;;  %v1117_v42 = vor.u32 %v1390_v28, %v1114_v29  ;;  %v969_v46 = vor.u32 %v1356_v32, %v968_v31 }
  0x1e   :  { %547 = vmatpush.bf16.msrb.mxu1 %v1165_v1  ;;  %522 = vmatpush.bf16.msra.mxu3 %v1145_v7  ;;  %v1386_v39 = vld [vmem:[#allocation2 + $0x104] sm:$0xf]  ;;  %v1088_v40 = vld [vmem:[#allocation2 + $0xe8] sm:$0xf]  ;;  %v1385_v41 = vld [vmem:[#allocation2 + $0xf4] sm:$0xf0]  ;;  %v1097_v49 = vor.u32 %v1388_v35, %v1096_v33  ;;  %v973_v53 = vor.u32 %v1354_v36, %v970_v37 }
  0x1f   :  { %v1098_v43 = vld [vmem:[#allocation2 + $0x110] sm:$0xf0]  ;;  %v1216_v44 = vld [vmem:[#allocation2 + $0x1e8] sm:$0xf]  ;;  %v1417_v45 = vld [vmem:[#allocation2 + $0x1f4] sm:$0xf0]  ;;  %v1089_v50 = vor.u32 %v1385_v41, %v1088_v40 }
  0x20   :  { %v1383_v47 = vld [vmem:[#allocation2 + $0xec] sm:$0xf]  ;;  %v1090_v48 = vld [vmem:[#allocation2 + $0xf8] sm:$0xf0]  ;;  %v1217_v54 = vor.u32 %v1417_v45, %v1216_v44  ;;  %v1072_v55 = vld [vmem:[#allocation2 + $0xc8] sm:$0xf]  ;;  %v1101_v57 = vor.u32 %v1386_v39, %v1098_v43 }
  0x21   :  { %535 = vmatpush.bf16.msrb.mxu0 %v1021_v10  ;;  %510 = vmatpush.bf16.msra.mxu2 %v1001_v16  ;;  %v1415_v51 = vld [vmem:[#allocation2 + $0x1ec] sm:$0xf]  ;;  %v1218_v52 = vld [vmem:[#allocation2 + $0x1f8] sm:$0xf0]  ;;  %v1381_v56 = vld [vmem:[#allocation2 + $0xd4] sm:$0xf0]  ;;  %v1093_v58 = vor.u32 %v1383_v47, %v1090_v48 }
  0x22   :  { %548 = vmatpush.bf16.msrb.mxu1 %v1149_v13  ;;  %523 = vmatpush.bf16.msra.mxu3 %v1129_v19  ;;  %v1200_v59 = vld [vmem:[#allocation2 + $0x1c8] sm:$0xf]  ;;  %v1413_v60 = vld [vmem:[#allocation2 + $0x1d4] sm:$0xf0]  ;;  %v1221_v61 = vor.u32 %v1415_v51, %v1218_v52  ;;  %v1379_v62 = vld [vmem:[#allocation2 + $0xcc] sm:$0xf]  ;;  %v1073_v0 = vor.u32 %v1381_v56, %v1072_v55 }
  0x23   :  { %v1074_v63 = vld [vmem:[#allocation2 + $0xd8] sm:$0xf0]  ;;  %v1411_v1 = vld [vmem:[#allocation2 + $0x1cc] sm:$0xf]  ;;  %v1201_v3 = vor.u32 %v1413_v60, %v1200_v59  ;;  %v1056_v6 = vld [vmem:[#allocation2 + $0xa8] sm:$0xf] }
  0x24   :  { %v1202_v2 = vld [vmem:[#allocation2 + $0x1d8] sm:$0xf0]  ;;  %v1077_v4 = vor.u32 %v1379_v62, %v1074_v63  ;;  %v1377_v7 = vld [vmem:[#allocation2 + $0xb4] sm:$0xf0]  ;;  %v1184_v8 = vld [vmem:[#allocation2 + $0x1a8] sm:$0xf] }
  0x25   :  { %536 = vmatpush.bf16.msrb.mxu0 %v1005_v22  ;;  %511 = vmatpush.bf16.msra.mxu2 %v985_v30  ;;  %v1205_v5 = vor.u32 %v1411_v1, %v1202_v2  ;;  %v1057_v9 = vor.u32 %v1377_v7, %v1056_v6  ;;  %v1409_v10 = vld [vmem:[#allocation2 + $0x1b4] sm:$0xf0]  ;;  %v1375_v11 = vld [vmem:[#allocation2 + $0xac] sm:$0xf]  ;;  %v1058_v12 = vld [vmem:[#allocation2 + $0xb8] sm:$0xf0] }
  0x26   :  { %549 = vmatpush.bf16.msrb.mxu1 %v1133_v26  ;;  %524 = vmatpush.bf16.msra.mxu3 %v1113_v34  ;;  %v1185_v13 = vor.u32 %v1409_v10, %v1184_v8  ;;  %v1061_v14 = vor.u32 %v1375_v11, %v1058_v12  ;;  %v1407_v15 = vld [vmem:[#allocation2 + $0x1ac] sm:$0xf]  ;;  %v1186_v16 = vld [vmem:[#allocation2 + $0x1b8] sm:$0xf0]  ;;  %v1040_v18 = vld [vmem:[#allocation2 + $0x88] sm:$0xf] }
  0x27   :  { %v1189_v17 = vor.u32 %v1407_v15, %v1186_v16  ;;  %v1373_v19 = vld [vmem:[#allocation2 + $0x94] sm:$0xf0]  ;;  %v1168_v20 = vld [vmem:[#allocation2 + $0x188] sm:$0xf]  ;;  %v1371_v23 = vld [vmem:[#allocation2 + $0x8c] sm:$0xf] }
  0x28   :  { %v1041_v21 = vor.u32 %v1373_v19, %v1040_v18  ;;  %v1405_v22 = vld [vmem:[#allocation2 + $0x194] sm:$0xf0]  ;;  %v1042_v24 = vld [vmem:[#allocation2 + $0x98] sm:$0xf0]  ;;  %v1403_v27 = vld [vmem:[#allocation2 + $0x18c] sm:$0xf] }
  0x29   :  { %537 = vmatpush.bf16.msrb.mxu0 %v989_v38  ;;  %512 = vmatpush.bf16.msra.mxu2 %v969_v46  ;;  %v1169_v25 = vor.u32 %v1405_v22, %v1168_v20  ;;  %v1045_v26 = vor.u32 %v1371_v23, %v1042_v24  ;;  %v1170_v28 = vld [vmem:[#allocation2 + $0x198] sm:$0xf0]  ;;  %v1024_v30 = vld [vmem:[#allocation2 + $0x68] sm:$0xf]  ;;  %v1369_v31 = vld [vmem:[#allocation2 + $0x74] sm:$0xf0] }
  0x2a   :  { %550 = vmatpush.bf16.msrb.mxu1 %v1117_v42  ;;  %525 = vmatpush.bf16.msra.mxu3 %v1097_v49  ;;  %v1173_v29 = vor.u32 %v1403_v27, %v1170_v28  ;;  %v1152_v32 = vld [vmem:[#allocation2 + $0x168] sm:$0xf]  ;;  %v1025_v33 = vor.u32 %v1369_v31, %v1024_v30  ;;  %v1401_v34 = vld [vmem:[#allocation2 + $0x174] sm:$0xf0]  ;;  %v1367_v35 = vld [vmem:[#allocation2 + $0x6c] sm:$0xf] }
  0x2b   :  { %v1026_v36 = vld [vmem:[#allocation2 + $0x78] sm:$0xf0]  ;;  %v1153_v37 = vor.u32 %v1401_v34, %v1152_v32  ;;  %v1399_v39 = vld [vmem:[#allocation2 + $0x16c] sm:$0xf]  ;;  %v1008_v42 = vld [vmem:[#allocation2 + $0x48] sm:$0xf] }
  0x2c   :  { %v1029_v38 = vor.u32 %v1367_v35, %v1026_v36  ;;  %v1154_v40 = vld [vmem:[#allocation2 + $0x178] sm:$0xf0]  ;;  %v1365_v43 = vld [vmem:[#allocation2 + $0x54] sm:$0xf0]  ;;  %v1136_v44 = vld [vmem:[#allocation2 + $0x148] sm:$0xf] }
  0x2d   :  { %557 = vmatpush.bf16.msrb.mxu2 %v1089_v50  ;;  %538 = vmatpush.bf16.msrb.mxu0 %v973_v53  ;;  %v1157_v41 = vor.u32 %v1399_v39, %v1154_v40  ;;  %v1009_v45 = vor.u32 %v1365_v43, %v1008_v42  ;;  %v1397_v46 = vld [vmem:[#allocation2 + $0x154] sm:$0xf0]  ;;  %v1363_v47 = vld [vmem:[#allocation2 + $0x4c] sm:$0xf]  ;;  %v1010_v48 = vld [vmem:[#allocation2 + $0x58] sm:$0xf0] }
  0x2e   :  { %570 = vmatpush.bf16.msrb.mxu3 %v1217_v54  ;;  %551 = vmatpush.bf16.msrb.mxu1 %v1101_v57  ;;  %v1137_v49 = vor.u32 %v1397_v46, %v1136_v44  ;;  %v1013_v50 = vor.u32 %v1363_v47, %v1010_v48  ;;  %v1395_v51 = vld [vmem:[#allocation2 + $0x14c] sm:$0xf]  ;;  %v1138_v52 = vld [vmem:[#allocation2 + $0x158] sm:$0xf0]  ;;  %v992_v53 = vld [vmem:[#allocation2 + $0x28] sm:$0xf] }
  0x2f   :  { %v1141_v54 = vor.u32 %v1395_v51, %v1138_v52  ;;  %v1361_v55 = vld [vmem:[#allocation2 + $0x34] sm:$0xf0]  ;;  %v1120_v56 = vld [vmem:[#allocation2 + $0x128] sm:$0xf]  ;;  %v1359_v59 = vld [vmem:[#allocation2 + $0x2c] sm:$0xf] }
  0x30   :  { %v1393_v57 = vld [vmem:[#allocation2 + $0x134] sm:$0xf0]  ;;  %v994_v60 = vld [vmem:[#allocation2 + $0x38] sm:$0xf0]  ;;  %v976_v1 = vld [vmem:[#allocation2 + $0x8] sm:$0xf] }
  0x31   :  { %583 = vmatpush.bf16.msra.mxu0 %v1093_v58  ;;  %558 = vmatpush.bf16.msrb.mxu2 %v1073_v0  ;;  %v993_v58 = vor.u32 %v1361_v55, %v992_v53  ;;  %v1121_v62 = vor.u32 %v1393_v57, %v1120_v56  ;;  %v997_v63 = vor.u32 %v1359_v59, %v994_v60  ;;  %v1122_v0 = vld [vmem:[#allocation2 + $0x138] sm:$0xf0]  ;;  %v1357_v2 = vld [vmem:[#allocation2 + $0x14] sm:$0xf0]  ;;  %v1355_v6 = vld [vmem:[#allocation2 + $0xc] sm:$0xf] }
  0x32   :  { %596 = vmatpush.bf16.msra.mxu1 %v1221_v61  ;;  %571 = vmatpush.bf16.msrb.mxu3 %v1201_v3  ;;  %v1391_v61 = vld [vmem:[#allocation2 + $0x12c] sm:$0xf]  ;;  %v978_v7 = vld [vmem:[#allocation2 + $0x18] sm:$0xf0]  ;;  %v977_v10 = vor.u32 %v1357_v2, %v976_v1  ;;  %v1432_v30 = vld [vmem:[%s1698_s5 + $0x70] sm:$0xff]  ;;  %s1512_s13 = smov [#allocation5]  }
  0x33   :  { %v1125_v3 = vor.u32 %v1391_v61, %v1122_v0  ;;  %v1387_v8 = vld [vmem:[#allocation2 + $0x10c] sm:$0xf]  ;;  %v981_v12 = vor.u32 %v1355_v6, %v978_v7  ;;  %v1433_v24 = vld [vmem:[%s1698_s5 + $0x78] sm:$0xff]  ;;  %v1424_v31 = vld [vmem:[%s1698_s5 + $0x30] sm:$0xff]  ;;  %s936_s3 = sshll.u32 %s1512_s13, 4  ;;  %s938_s16 = sshll.u32 %s1700_s7, 4  ;;  %s937_s3 = int_to_ptr.vmem [resolvable:$true] %s936_s3  ;;  %s939_s16 = int_to_ptr.hbm [resolvable:$true] %s938_s16 }
  0x34   :  { %v1449_v27 = vld [vmem:[%s1698_s5 + $0xf8] sm:$0xff]  ;;  %v1448_v32 = vld [vmem:[%s1698_s5 + $0xf0] sm:$0xff]  ;;  %v1423_v34 = vld [vmem:[%s1698_s5 + $0x28] sm:$0xff]  ;;  %vm929_vm1 = vcmask 523264  }
  0x35   :  { %584 = vmatpush.bf16.msra.mxu0 %v1077_v4  ;;  %559 = vmatpush.bf16.msrb.mxu2 %v1057_v9  ;;  %v1104_v4 = vld [vmem:[#allocation2 + $0x108] sm:$0xf]  ;;  %v1106_v9 = vld [vmem:[#allocation2 + $0x118] sm:$0xf0]  ;;  %v1430_v35 = vld [vmem:[%s1698_s5 + $0x60] sm:$0xff] }
  0x36   :  { %597 = vmatpush.bf16.msra.mxu1 %v1205_v5  ;;  %572 = vmatpush.bf16.msrb.mxu3 %v1185_v13  ;;  %v1389_v5 = vld [vmem:[#allocation2 + $0x114] sm:$0xf0]  ;;  %v1109_v13 = vor.u32 %v1387_v8, %v1106_v9  ;;  %v1422_v36 = vld [vmem:[%s1698_s5 + $0x20] sm:$0xff]  ;;  %v1447_v42 = vld [vmem:[%s1698_s5 + $0xe8] sm:$0xff] }
  0x37   :  { %v1105_v11 = vor.u32 %v1389_v5, %v1104_v4  ;;  %v1421_v39 = vld [vmem:[%s1698_s5 + $0x18] sm:$0xff]  ;;  %v1420_v43 = vld [vmem:[%s1698_s5 + $0x10] sm:$0xff]  ;;  %v1446_v46 = vld [vmem:[%s1698_s5 + $0xe0] sm:$0xff] }
  0x38   :  { %v1441_v40 = vld [vmem:[%s1698_s5 + $0xb8] sm:$0xff]  ;;  %v1440_v44 = vld [vmem:[%s1698_s5 + $0xb0] sm:$0xff]  ;;  %v1419_v47 = vld [vmem:[%s1698_s5 + $0x8] sm:$0xff] }
  0x39   :  { %585 = vmatpush.bf16.msra.mxu0 %v1061_v14  ;;  %560 = vmatpush.bf16.msrb.mxu2 %v1041_v21  ;;  %v44_v14 = vld [vmem:[%s1695_s2] sm:$0x3]  ;;  %v1439_v48 = vld [vmem:[%s1698_s5 + $0xa8] sm:$0xff]  ;;  %v1444_v52 = vld [vmem:[%s1698_s5 + $0xd0] sm:$0xff] }
  0x3a   :  { %598 = vmatpush.bf16.msra.mxu1 %v1189_v17  ;;  %573 = vmatpush.bf16.msrb.mxu3 %v1169_v25  ;;  %v54_v15 = vperm.slane %v44_v14, 0  ;;  %v55_v16 = vperm.slane %v44_v14, 1  ;;  %v1425_v25 = vld [vmem:[%s1698_s5 + $0x38] sm:$0xff]  ;;  %v1438_v51 = vld [vmem:[%s1698_s5 + $0xa0] sm:$0xff]  ;;  %v1436_v55 = vld [vmem:[%s1698_s5 + $0x90] sm:$0xff] }
  0x3b   :  { %v1437_v53 = vld [vmem:[%s1698_s5 + $0x98] sm:$0xff]  ;;  %v1442_v56 = vld [vmem:[%s1698_s5 + $0xc0] sm:$0xff]  ;;  %v1435_v57 = vld [vmem:[%s1698_s5 + $0x88] sm:$0xff] }
  0x3c   :  { %v1434_v59 = vld [vmem:[%s1698_s5 + $0x80] sm:$0xff] }
  0x3d   :  { %586 = vmatpush.bf16.msra.mxu0 %v1045_v26  ;;  %561 = vmatpush.bf16.msrb.mxu2 %v1025_v33  ;;  %v1431_v33 = vld [vmem:[%s1698_s5 + $0x68] sm:$0xff] }
  0x3e   :  { %599 = vmatpush.bf16.msra.mxu1 %v1173_v29  ;;  %574 = vmatpush.bf16.msrb.mxu3 %v1153_v37  ;;  %v1429_v37 = vld [vmem:[%s1698_s5 + $0x58] sm:$0xff] }
  0x41   :  { %587 = vmatpush.bf16.msra.mxu0 %v1029_v38  ;;  %562 = vmatpush.bf16.msrb.mxu2 %v1009_v45  ;;  %v1428_v38 = vld [vmem:[%s1698_s5 + $0x50] sm:$0xff]  ;;  %v1426_v45 = vld [vmem:[%s1698_s5 + $0x40] sm:$0xff] }
  0x42   :  { %600 = vmatpush.bf16.msra.mxu1 %v1157_v41  ;;  %575 = vmatpush.bf16.msrb.mxu3 %v1137_v49  ;;  %v1427_v41 = vld [vmem:[%s1698_s5 + $0x48] sm:$0xff]  ;;  %v1445_v49 = vld [vmem:[%s1698_s5 + $0xd8] sm:$0xff] }
  0x45   :  { %588 = vmatpush.bf16.msra.mxu0 %v1013_v50  ;;  %563 = vmatpush.bf16.msrb.mxu2 %v993_v58  ;;  %v1418_v50 = vld [vmem:[%s1698_s5] sm:$0xff] }
  0x46   :  { %601 = vmatpush.bf16.msra.mxu1 %v1141_v54  ;;  %576 = vmatpush.bf16.msrb.mxu3 %v1121_v62  ;;  %v1443_v54 = vld [vmem:[%s1698_s5 + $0xc8] sm:$0xff]  ;;  %v45_v58 = vld [vmem:[%s1697_s4] sm:$0xf] }
  0x47   :  { %v178_v60 = vperm.slane %v45_v58, 1  ;;  %v177_v1 = vperm.slane %v45_v58, 0 }
  0x49   :  { %589 = vmatpush.bf16.msra.mxu0 %v997_v63  ;;  %564 = vmatpush.bf16.msrb.mxu2 %v977_v10 }
  0x4a   :  { %602 = vmatpush.bf16.msra.mxu1 %v1125_v3  ;;  %577 = vmatpush.bf16.msrb.mxu3 %v1105_v11 }
  0x4d   :  { %590 = vmatpush.bf16.msra.mxu0 %v981_v12  ;;  %v180_v12 = vperm.slane %v45_v58, 3 }
  0x4e   :  { %603 = vmatpush.bf16.msra.mxu1 %v1109_v13 }
  0x8d   :  { %v91_v17 = vpop.f32.mrf.mxu0 }
  0x8e   :  { %v92_v18 = vadd.f32 %v91_v17, %v54_v15 }
  0x90   :  { %v104_v19 = vpop.f32.mrf.mxu1  ;;  %v108_v21 = vmax.f32 %v92_v18, 0.0 }
  0x91   :  { %v105_v20 = vadd.f32 %v104_v19, %v55_v16  ;;  %v179_v19 = vperm.slane %v45_v58, 2 }
  0x92   :  { %v110_v23 = vpack.c.bf16 %v108_v21, %v108_v21 }
  0x93   :  { %v109_v22 = vmax.f32 %v105_v20, 0.0 }
  0x94   :  { %513 = vmatmul.bf16.vlgmr.msra.gmra.mxu2 %v110_v23  ;;  %539 = vmatmul.bf16.vlgmr.msrb.gmra.mxu0 %v110_v23 }
  0x95   :  { %v111_v26 = vpack.c.bf16 %v109_v22, %v109_v22  ;;  %v93_v28 = vpop.f32.mrf.mxu0  ;;  %876 = vmatpush.bf16.msra.mxu2 %v1425_v25  ;;  %902 = vmatpush.bf16.msrb.mxu0 %v1441_v40 }
  0x97   :  { %526 = vmatmul.bf16.vlgmr.msra.gmra.mxu3 %v111_v26  ;;  %552 = vmatmul.bf16.vlgmr.msrb.gmra.mxu1 %v111_v26 }
  0x98   :  { %v106_v29 = vpop.f32.mrf.mxu1  ;;  %889 = vmatpush.bf16.msra.mxu3 %v1433_v24  ;;  %915 = vmatpush.bf16.msrb.mxu1 %v1449_v27 }
  0x99   :  { %877 = vmatpush.bf16.msra.mxu2 %v1424_v31  ;;  %903 = vmatpush.bf16.msrb.mxu0 %v1440_v44 }
  0x9c   :  { %890 = vmatpush.bf16.msra.mxu3 %v1432_v30  ;;  %916 = vmatpush.bf16.msrb.mxu1 %v1448_v32 }
  0x9d   :  { %878 = vmatpush.bf16.msra.mxu2 %v1423_v34  ;;  %904 = vmatpush.bf16.msrb.mxu0 %v1439_v48  ;;  %v1454_v34 = vld [vmem:[%s1699_s6] ss:$0 sm:$0xff] }
  0xa0   :  { %891 = vmatpush.bf16.msra.mxu3 %v1431_v33  ;;  %917 = vmatpush.bf16.msrb.mxu1 %v1447_v42 }
  0xa1   :  { %879 = vmatpush.bf16.msra.mxu2 %v1422_v36  ;;  %905 = vmatpush.bf16.msrb.mxu0 %v1438_v51 }
  0xa4   :  { %892 = vmatpush.bf16.msra.mxu3 %v1430_v35  ;;  %565 = vmatmul.bf16.vlgmr.msrb.gmra.mxu2 %v110_v23 }
  0xa5   :  { %591 = vmatmul.bf16.vlgmr.msra.gmra.mxu0 %v110_v23  ;;  %880 = vmatpush.bf16.msra.mxu2 %v1421_v39 }
  0xa6   :  { %918 = vmatpush.bf16.msrb.mxu1 %v1446_v46  ;;  %906 = vmatpush.bf16.msrb.mxu0 %v1437_v53 }
  0xa7   :  { %578 = vmatmul.bf16.vlgmr.msrb.gmra.mxu3 %v111_v26  ;;  %604 = vmatmul.bf16.vlgmr.msra.gmra.mxu1 %v111_v26 }
  0xa8   :  { %893 = vmatpush.bf16.msra.mxu3 %v1429_v37 }
  0xa9   :  { %881 = vmatpush.bf16.msra.mxu2 %v1420_v43 }
  0xaa   :  { %919 = vmatpush.bf16.msrb.mxu1 %v1445_v49  ;;  %907 = vmatpush.bf16.msrb.mxu0 %v1436_v55 }
  0xac   :  { %894 = vmatpush.bf16.msra.mxu3 %v1428_v38 }
  0xad   :  { %882 = vmatpush.bf16.msra.mxu2 %v1419_v47 }
  0xae   :  { %920 = vmatpush.bf16.msrb.mxu1 %v1444_v52  ;;  %908 = vmatpush.bf16.msrb.mxu0 %v1435_v57 }
  0xb0   :  { %895 = vmatpush.bf16.msra.mxu3 %v1427_v41 }
  0xb1   :  { %883 = vmatpush.bf16.msra.mxu2 %v1418_v50 }
  0xb2   :  { %921 = vmatpush.bf16.msrb.mxu1 %v1443_v54  ;;  %909 = vmatpush.bf16.msrb.mxu0 %v1434_v59 }
  0xb4   :  { %896 = vmatpush.bf16.msra.mxu3 %v1426_v45 }
  0xb6   :  { %922 = vmatpush.bf16.msrb.mxu1 %v1442_v56 }
 0x111   :  { %v540_v61 = vpop.f32.mrf.mxu0 }
 0x112   :  { %v541_v62 = vadd.f32 %v540_v61, %v178_v60 }
 0x114   :  { %v553_v63 = vpop.f32.mrf.mxu1 }
 0x115   :  { %v554_v0 = vadd.f32 %v553_v63, %v541_v62 }
 0x117   :  { %v610_v2 = vmax.f32 %v554_v0, 0.0  ;;  %v514_v3 = vpop.f32.mrf.mxu2 }
 0x118   :  { %v515_v5 = vadd.f32 %v514_v3, %v177_v1 }
 0x119   :  { %v614_v4 = vpack.c.bf16 %v610_v2, %v610_v2  ;;  %v542_v7 = vpop.f32.mrf.mxu0 }
 0x11a   :  { %v527_v6 = vpop.f32.mrf.mxu3 }
 0x11b   :  { %v528_v8 = vadd.f32 %v527_v6, %v515_v5  ;;  %897 = vmatmul.bf16.vlgmr.msra.gmra.mxu3 %v614_v4 }
 0x11c   :  { %v555_v9 = vpop.f32.mrf.mxu1 }
 0x11d   :  { %v609_v10 = vmax.f32 %v528_v8, 0.0 }
 0x11f   :  { %v613_v11 = vpack.c.bf16 %v609_v10, %v609_v10  ;;  %v516_v13 = vpop.f32.mrf.mxu2 }
 0x121   :  { %884 = vmatmul.bf16.vlgmr.msra.gmra.mxu2 %v613_v11 }
 0x122   :  { %v529_v14 = vpop.f32.mrf.mxu3  ;;  %v592_v15 = vpop.f32.mrf.mxu0 }
 0x123   :  { %v593_v16 = vadd.f32 %v592_v15, %v180_v12 }
 0x124   :  { %v605_v17 = vpop.f32.mrf.mxu1 }
 0x125   :  { %v606_v18 = vadd.f32 %v605_v17, %v593_v16 }
 0x127   :  { %v612_v20 = vmax.f32 %v606_v18, 0.0  ;;  %v566_v21 = vpop.f32.mrf.mxu2 }
 0x128   :  { %v567_v23 = vadd.f32 %v566_v21, %v179_v19 }
 0x129   :  { %v616_v22 = vpack.c.bf16 %v612_v20, %v612_v20 }
 0x12a   :  { %v579_v24 = vpop.f32.mrf.mxu3  ;;  %v594_v25 = vpop.f32.mrf.mxu0 }
 0x12b   :  { %v580_v26 = vadd.f32 %v579_v24, %v567_v23  ;;  %923 = vmatmul.bf16.vlgmr.msrb.gmra.mxu1 %v616_v22 }
 0x12c   :  { %v607_v27 = vpop.f32.mrf.mxu1 }
 0x12d   :  { %v611_v28 = vmax.f32 %v580_v26, 0.0 }
 0x12f   :  { %v615_v29 = vpack.c.bf16 %v611_v28, %v611_v28  ;;  %v568_v30 = vpop.f32.mrf.mxu2 }
 0x131   :  { %910 = vmatmul.bf16.vlgmr.msrb.gmra.mxu0 %v615_v29 }
 0x132   :  { %v581_v31 = vpop.f32.mrf.mxu3 }
 0x19e   :  { %v898_v32 = vpop.f32.mrf.mxu3 }
 0x1a4   :  { %v885_v33 = vpop.f32.mrf.mxu2 }
 0x1a5   :  { %v886_v37 = vadd.f32 %v1454_v34, %v885_v33 }
 0x1a6   :  { %v900_v35 = vpop.f32.mrf.mxu3 }
 0x1a7   :  { %v899_v39 = vadd.f32 %v898_v32, %v886_v37 }
 0x1a8   :  { %v924_v36 = vpop.f32.mrf.mxu1 }
 0x1ac   :  { %v887_v38 = vpop.f32.mrf.mxu2 }
 0x1ae   :  { %v911_v40 = vpop.f32.mrf.mxu0 }
 0x1af   :  { %v912_v41 = vadd.f32 %v911_v40, %v899_v39 }
 0x1b0   :  { %v926_v42 = vpop.f32.mrf.mxu1 }
 0x1b1   :  { %v925_v43 = vadd.f32 %v924_v36, %v912_v41 }
 0x1b3   :  { %1455 = vtanh.f32 %v925_v43 }
 0x1b6   :  { %v913_v44 = vpop.f32.mrf.mxu0 }
 0x1b9   :  { %v1456_v45 = vpop.eup %1455 }
 0x1ba   :  { %930 = vst.msk [vmem:[#allocation5] sm:$0xff] %vm929_vm1, %v1456_v45 }
 0x1bb   :  { %941 = dma.vmem_to_hbm [thread:$0]  %s937_s3, 128, %s939_s16, [#allocation4]  }
 0x1bc   :  { %1507 = dma.done.wait [#allocation4], 128  }
 0x1bd   :  { %1508 = vsyncadd [#allocation4], 4294967168 }
 0x1be   :  { %946 = vsyncpa [#allocation3], 1 }
 0x1bf   :  { %947 = vsyncpa [#allocation4], 1 }

</bundles_post_ra>
